<compile_context>
chip_gen: v6e
topology: v6e:2x2x1
jax: 0.10.0
libtpu: 0.0.40
codegen_flags: <defaults>
</compile_context>

<pallas_src>
import jax
import jax.numpy as jnp
from jax import lax
from jax.experimental import pallas as pl
from jax.experimental.pallas import tpu as pltpu


def _pam_strip_kernel(q_ref, k_ref, v_ref, o_ref, m_ref, l_ref):
    """One (batch, key-column-strip) step of PAM attention.

    q_ref, v_ref : (1, C, N)   full per-batch tiles (native dtype)
    k_ref        : (1, C, TN)  key column strip     (native dtype)
    o_ref        : (1, C, TN)  un-normalized output strip, f32
    m_ref, l_ref : (1, 1, 1, 128) strip-local max / exp-sum (lane-broadcast)
    """
    q = q_ref[0]      # (C, N)
    k = k_ref[0]      # (C, TN)
    v = v_ref[0]      # (C, N)

    # Energy strip s[n, m] = sum_c q[c, n] * k[c, m].  Contracting dim 0 of
    # both operands lets Mosaic fold the transpose into the MXU operand feed.
    s = lax.dot_general(
        q, k, (((0,), (0,)), ((), ())),
        preferred_element_type=jnp.float32)              # (N, TN), f32

    # Strip-local softmax statistics (kept in f32).
    m_loc = jnp.max(s)
    e = jnp.exp(s - m_loc)                               # f32, values <= 1
    l_loc = jnp.sum(e)                                   # f32 accumulation

    # Un-normalized output strip: MXU operands in the input dtype, f32 acc.
    o = jnp.dot(v, e.astype(v.dtype),
                preferred_element_type=jnp.float32)      # (C, TN), f32

    o_ref[0] = o
    m_ref[...] = jnp.broadcast_to(m_loc, m_ref.shape)
    l_ref[...] = jnp.broadcast_to(l_loc, l_ref.shape)


def _pick_col_tile(n):
    """Largest key-column strip width keeping BlockSpecs (8,128)-legal."""
    if n % 128 != 0:
        return n                      # single full-width strip (block == full dim)
    for t in (512, 384, 256, 128):
        if t <= n and n % t == 0:
            return t
    return n


def pam_module(v1, q1, k1, *, channels, height, width, col_tile=None):
    """Pallas implementation of PAM_Module.forward.

    v1, q1, k1: (B, C, H, W) arrays. Returns (B, C, H, W).
    """
    B = v1.shape[0]
    C = channels
    N = height * width
    dtype = v1.dtype

    v = v1.reshape(B, C, N)
    q = q1.reshape(B, C, N)
    k = k1.reshape(B, C, N)

    tn = _pick_col_tile(N) if col_tile is None else col_tile
    assert N % tn == 0, "column tile must divide H*W"
    T = N // tn

    full_spec = pl.BlockSpec((1, C, N), lambda b, j: (b, 0, 0))
    strip_spec = pl.BlockSpec((1, C, tn), lambda b, j: (b, 0, j))
    out_spec = pl.BlockSpec((1, C, tn), lambda b, j: (b, 0, j))
    stat_spec = pl.BlockSpec((1, 1, 1, 128), lambda b, j: (b, j, 0, 0))

    # Scoped-VMEM budget sized from the actual tile footprint (q/v resident,
    # double-buffered k / out strips, (N, TN) f32 intermediates), capped at
    # 64 MiB so it is valid on v5e/v6e/v7x alike.
    itemsize = jnp.dtype(dtype).itemsize
    est = (2 * C * N * itemsize          # q + v blocks resident
           + 2 * C * tn * itemsize       # double-buffered k strip
           + 2 * C * tn * 4              # double-buffered f32 out strip
           + 3 * N * tn * 4)             # energy / exp intermediates
    vmem_limit = max(32 * 1024 * 1024, min(int(est * 2), 64 * 1024 * 1024))

    out_unnorm, m_loc, l_loc = pl.pallas_call(
        _pam_strip_kernel,
        out_shape=(
            jax.ShapeDtypeStruct((B, C, N), jnp.float32),
            jax.ShapeDtypeStruct((B, T, 1, 128), jnp.float32),
            jax.ShapeDtypeStruct((B, T, 1, 128), jnp.float32),
        ),
        grid_spec=pltpu.PrefetchScalarGridSpec(
            num_scalar_prefetch=0,
            grid=(B, T),
            in_specs=[full_spec, strip_spec, full_spec],
            out_specs=[out_spec, stat_spec, stat_spec],
        ),
        compiler_params=pltpu.CompilerParams(
            dimension_semantics=("parallel", "parallel"),
            vmem_limit_bytes=vmem_limit,
        ),
    )(q, k, v)

    # Epilogue: fold the strip-local statistics into the GLOBAL softmax
    # normalizer and apply it once per output column on the (C, N) result
    # (never on the (N, N) map), then the residual add.  O(B*C*N) elementwise.
    m_loc = m_loc[:, :, 0, 0]                              # (B, T)
    l_loc = l_loc[:, :, 0, 0]                              # (B, T)
    gmax = jnp.max(m_loc, axis=1, keepdims=True)           # (B, 1) global max
    w = jnp.exp(m_loc - gmax)                              # (B, T)
    denom = jnp.sum(w * l_loc, axis=1, keepdims=True)      # (B, 1) global sum
    col_scale = jnp.repeat(w / denom, tn, axis=1)          # (B, N)
    out = out_unnorm * col_scale[:, None, :] + v.astype(jnp.float32)
    return out.astype(dtype).reshape(B, C, height, width)


def _pam_reference(v1, q1, k1, *, channels, height, width):
    """Pure-JAX reference matching the PyTorch forward exactly."""
    B = v1.shape[0]
    N = height * width
    v = v1.reshape(B, channels, N).astype(jnp.float32)
    q = q1.reshape(B, channels, N).astype(jnp.float32)
    k = k1.reshape(B, channels, N).astype(jnp.float32)
    att = jnp.einsum("bcn,bcm->bnm", q, k)                 # q^T @ k, (B, N, N)
    att = jax.nn.softmax(att.reshape(B, N * N), axis=1)    # global softmax
    att = att.reshape(B, N, N)
    out = jnp.einsum("bcn,bnm->bcm", v, att)               # (B, C, N)
    out = out + v
    return out.astype(v1.dtype).reshape(B, channels, height, width)


if __name__ == "__main__":
    configs = [
        dict(B=2, C=16, H=16, W=16),   # N=256 -> two 128-wide strips (tiled path)
        dict(B=2, C=8, H=5, W=5),      # N=25  -> single full-width strip fallback
    ]

    key = jax.random.PRNGKey(0)
    for cfg in configs:
        B, C, H, W = cfg["B"], cfg["C"], cfg["H"], cfg["W"]
        key, kv_, kq_, kk_ = jax.random.split(key, 4)
        v1 = jax.random.normal(kv_, (B, C, H, W), dtype=jnp.float32)
        q1 = jax.random.normal(kq_, (B, C, H, W), dtype=jnp.float32)
        k1 = jax.random.normal(kk_, (B, C, H, W), dtype=jnp.float32)

        out = pam_module(v1, q1, k1, channels=C, height=H, width=W)
        out = jax.block_until_ready(out)

        ref = _pam_reference(v1, q1, k1, channels=C, height=H, width=W)
        assert out.shape == (B, C, H, W)
        assert jnp.allclose(out, ref, atol=1e-4, rtol=1e-4), (
            f"mismatch vs reference for config {cfg}: "
            f"max abs err {float(jnp.max(jnp.abs(out - ref)))}")

    print("KERNEL_OK")
</pallas_src>

<mosaic_0001>
module attributes {stable_mosaic.version = 11 : i64} {
  func.func @_pam_strip_kernel(%arg0: i32, %arg1: i32, %arg2: memref<1x16x256xf32, #tpu.memory_space<vmem>>, %arg3: memref<1x16x256xf32, #tpu.memory_space<vmem>>, %arg4: memref<1x16x256xf32, #tpu.memory_space<vmem>>, %arg5: memref<1x16x256xf32, #tpu.memory_space<vmem>>, %arg6: memref<1x1x1x128xf32, #tpu.memory_space<vmem>>, %arg7: memref<1x1x1x128xf32, #tpu.memory_space<vmem>>) attributes {dimension_semantics = [#tpu.dimension_semantics<parallel>, #tpu.dimension_semantics<parallel>], iteration_bounds = array<i64: 2, 1>, scalar_prefetch = 0 : i64, scratch_operands = 0 : i64, tpu.core_type = #tpu.core_type<tc>, window_params = [{transform_indices = @transform_0, window_bounds = array<i64: 1, 16, 256>}, {transform_indices = @transform_1, window_bounds = array<i64: 1, 16, 256>}, {transform_indices = @transform_2, window_bounds = array<i64: 1, 16, 256>}, {transform_indices = @transform_3, window_bounds = array<i64: 1, 16, 256>}, {transform_indices = @transform_4, window_bounds = array<i64: 1, 1, 1, 128>}, {transform_indices = @transform_5, window_bounds = array<i64: 1, 1, 1, 128>}]} {
    %c0 = arith.constant 0 : index
    %c0_0 = arith.constant 0 : index
    %c0_1 = arith.constant 0 : index
    %0 = vector.load %arg2[%c0, %c0_0, %c0_1] : memref<1x16x256xf32, #tpu.memory_space<vmem>>, vector<1x16x256xf32>
    %1 = vector.shape_cast %0 : vector<1x16x256xf32> to vector<16x256xf32>
    %c0_2 = arith.constant 0 : index
    %c0_3 = arith.constant 0 : index
    %c0_4 = arith.constant 0 : index
    %2 = vector.load %arg3[%c0_2, %c0_3, %c0_4] : memref<1x16x256xf32, #tpu.memory_space<vmem>>, vector<1x16x256xf32>
    %3 = vector.shape_cast %2 : vector<1x16x256xf32> to vector<16x256xf32>
    %c0_5 = arith.constant 0 : index
    %c0_6 = arith.constant 0 : index
    %c0_7 = arith.constant 0 : index
    %4 = vector.load %arg4[%c0_5, %c0_6, %c0_7] : memref<1x16x256xf32, #tpu.memory_space<vmem>>, vector<1x16x256xf32>
    %5 = vector.shape_cast %4 : vector<1x16x256xf32> to vector<16x256xf32>
    %cst = arith.constant dense<0.000000e+00> : vector<256x256xf32>
    %6 = tpu.matmul %1, %3, %cst {dimension_numbers = #tpu.dot_dimension_numbers<[0], [0], [1], [1], [0, 1, 1, 1], [], []>} : vector<16x256xf32>, vector<16x256xf32>, vector<256x256xf32> -> vector<256x256xf32>
    %7 = vector.shape_cast %6 : vector<256x256xf32> to vector<1x256x256xf32>
    %cst_8 = arith.constant dense<0xFF800000> : vector<1xf32>
    %8 = vector.multi_reduction <maximumf>, %7, %cst_8 [1, 2] : vector<1x256x256xf32> to vector<1xf32>
    %9 = vector.shape_cast %8 : vector<1xf32> to vector<1x1x1xf32>
    %10 = vector.extract %9[0, 0, 0] : f32 from vector<1x1x1xf32>
    %11 = vector.broadcast %10 : f32 to vector<256x256xf32>
    %12 = arith.subf %6, %11 : vector<256x256xf32>
    %13 = math.exp %12 : vector<256x256xf32>
    %14 = vector.shape_cast %13 : vector<256x256xf32> to vector<1x256x256xf32>
    %cst_9 = arith.constant dense<0.000000e+00> : vector<1xf32>
    %15 = vector.multi_reduction <add>, %14, %cst_9 [1, 2] : vector<1x256x256xf32> to vector<1xf32>
    %16 = vector.shape_cast %15 : vector<1xf32> to vector<1x1x1xf32>
    %17 = vector.extract %16[0, 0, 0] : f32 from vector<1x1x1xf32>
    %cst_10 = arith.constant dense<0.000000e+00> : vector<16x256xf32>
    %18 = tpu.matmul %5, %13, %cst_10 {dimension_numbers = #tpu.dot_dimension_numbers<[1], [0], [0], [1], [0, 0, 1, 1], [], []>} : vector<16x256xf32>, vector<256x256xf32>, vector<16x256xf32> -> vector<16x256xf32>
    %c0_11 = arith.constant 0 : index
    %c0_12 = arith.constant 0 : index
    %c0_13 = arith.constant 0 : index
    %19 = vector.load %arg5[%c0_11, %c0_12, %c0_13] : memref<1x16x256xf32, #tpu.memory_space<vmem>>, vector<1x16x256xf32>
    %20 = vector.shape_cast %19 : vector<1x16x256xf32> to vector<16x256xf32>
    %21 = vector.shape_cast %18 : vector<16x256xf32> to vector<1x16x256xf32>
    tpu.vector_store %arg5[%c0_11, %c0_12, %c0_13], %21 {strides = array<i32>} : memref<1x16x256xf32, #tpu.memory_space<vmem>>, vector<1x16x256xf32>,
    %22 = vector.broadcast %10 : f32 to vector<1x1x1x128xf32>
    %c0_14 = arith.constant 0 : index
    %c0_15 = arith.constant 0 : index
    %c0_16 = arith.constant 0 : index
    %c0_17 = arith.constant 0 : index
    %23 = vector.load %arg6[%c0_14, %c0_15, %c0_16, %c0_17] : memref<1x1x1x128xf32, #tpu.memory_space<vmem>>, vector<1x1x1x128xf32>
    tpu.vector_store %arg6[%c0_14, %c0_15, %c0_16, %c0_17], %22 {strides = array<i32>} : memref<1x1x1x128xf32, #tpu.memory_space<vmem>>, vector<1x1x1x128xf32>,
    %24 = vector.broadcast %17 : f32 to vector<1x1x1x128xf32>
    %c0_18 = arith.constant 0 : index
    %c0_19 = arith.constant 0 : index
    %c0_20 = arith.constant 0 : index
    %c0_21 = arith.constant 0 : index
    %25 = vector.load %arg7[%c0_18, %c0_19, %c0_20, %c0_21] : memref<1x1x1x128xf32, #tpu.memory_space<vmem>>, vector<1x1x1x128xf32>
    tpu.vector_store %arg7[%c0_18, %c0_19, %c0_20, %c0_21], %24 {strides = array<i32>} : memref<1x1x1x128xf32, #tpu.memory_space<vmem>>, vector<1x1x1x128xf32>,
    return
  }
  func.func @transform_0(%arg0: i32, %arg1: i32) -> (i32, i32, i32) {
    %c0_i32 = arith.constant 0 : i32
    %c0_i32_0 = arith.constant 0 : i32
    %c0_i32_1 = arith.constant 0 : i32
    return %arg0, %c0_i32, %c0_i32_0 : i32, i32, i32
  }
  func.func @transform_1(%arg0: i32, %arg1: i32) -> (i32, i32, i32) {
    %c0_i32 = arith.constant 0 : i32
    %c0_i32_0 = arith.constant 0 : i32
    return %arg0, %c0_i32, %arg1 : i32, i32, i32
  }
  func.func @transform_2(%arg0: i32, %arg1: i32) -> (i32, i32, i32) {
    %c0_i32 = arith.constant 0 : i32
    %c0_i32_0 = arith.constant 0 : i32
    %c0_i32_1 = arith.constant 0 : i32
    return %arg0, %c0_i32, %c0_i32_0 : i32, i32, i32
  }
  func.func @transform_3(%arg0: i32, %arg1: i32) -> (i32, i32, i32) {
    %c0_i32 = arith.constant 0 : i32
    %c0_i32_0 = arith.constant 0 : i32
    return %arg0, %c0_i32, %arg1 : i32, i32, i32
  }
  func.func @transform_4(%arg0: i32, %arg1: i32) -> (i32, i32, i32, i32) {
    %c0_i32 = arith.constant 0 : i32
    %c0_i32_0 = arith.constant 0 : i32
    %c0_i32_1 = arith.constant 0 : i32
    return %arg0, %arg1, %c0_i32, %c0_i32_0 : i32, i32, i32, i32
  }
  func.func @transform_5(%arg0: i32, %arg1: i32) -> (i32, i32, i32, i32) {
    %c0_i32 = arith.constant 0 : i32
    %c0_i32_0 = arith.constant 0 : i32
    %c0_i32_1 = arith.constant 0 : i32
    return %arg0, %arg1, %c0_i32, %c0_i32_0 : i32, i32, i32, i32
  }
}

</mosaic_0001>

<bundles_post_ra>
// kernel: tpu_custom_call.1
= control target key start
LH: loop header
LB: loop body
LE: loop exit
PB: predicated region body
PF: predicated region fallthrough
CT: control target
= control target key end

     0   :  { %s2848_s0 = inlined_call_operand.hbm [shape: f32[2,16,256], index: 0, kind: input, shape index: {}]   ;;  %s2849_s1 = inlined_call_operand.hbm [shape: f32[2,16,256], index: 1, kind: input, shape index: {}]   ;;  %s2850_s2 = inlined_call_operand.hbm [shape: f32[2,16,256], index: 2, kind: input, shape index: {}]   ;;  %s2851_s3 = inlined_call_operand.hbm [shape: f32[2,16,256], index: 3, kind: output, shape index: {0}]   ;;  %s2852_s4 = inlined_call_operand.hbm [shape: f32[2,1,1,128], index: 4, kind: output, shape index: {1}]   ;;  %s2853_s5 = inlined_call_operand.hbm [shape: f32[2,1,1,128], index: 5, kind: output, shape index: {2}]  }
   0x1   :  { %2880 = sst [smem:[#allocation39_spill]] %s2849_s1 }
   0x2   :  { %11 = vsyncpa [#allocation3], 0 }
   0x3   :  { %13 = vsyncpa [#allocation3 + $0x1], 0 }
   0x4   :  { %14 = vsyncpa [#allocation6], 0 }
   0x5   :  { %16 = vsyncpa [#allocation6 + $0x1], 0 }
   0x6   :  { %17 = vsyncpa [#allocation4], 0 }
   0x7   :  { %19 = vsyncpa [#allocation4 + $0x1], 0 }
   0x8   :  { %20 = vsyncpa [#allocation10], 0 }
   0x9   :  { %22 = vsyncpa [#allocation10 + $0x1], 0  ;;  %s1995_s18 = smov 0   ;;  %s1997_s19 = smov 0  }
   0xa   :  { %s1999_s20 = smov 0   ;;  %s2001_s21 = smov 0  }
   0xb   :  { %s2003_s22 = smov 0   ;;  %s2005_s23 = smov 0  }
   0xc LB: > { %2881 = sst [smem:[#allocation16_spill]] %s1932_s18  ;;  %s2026_s24 = sadd.s32 4294967295, %s1952_s23   ;;  %s1952_s23 = sphi %s2005_s23, %s28_s23   ;;  %s1948_s22 = sphi %s2003_s22, %s2937_s22   ;;  %s1944_s21 = sphi %s2001_s21, %s2936_s21   ;;  %s1940_s20 = sphi %s1999_s20, %s2940_s20   ;;  %s1936_s19 = sphi %s1997_s19, %s2939_s19   ;;  %s1932_s18 = sphi %s1995_s18, %s2938_s18  }
   0xd   : > { %2882 = sst [smem:[#allocation17_spill]] %s1948_s22  ;;  %s2854_s25 = sadd.s32 4294967294, %s1952_s23  }
   0xe   : > { %s40_s26 = sadd.s32 1, %s1948_s22  ;;  %s47_s27 = sadd.s32 1, %s1940_s20 }
   0xf   : > { %p42_p0 = scmp.ge.s32.totalorder %s40_s26, 2  ;;  %p54_p1 = scmp.ne.s32.totalorder %s1940_s20, %s1936_s19 }
  0x10   : > { %p55_p2 = scmp.eq.s32.totalorder %s1952_s23, 0  ;;  %p60_p3 = scmp.ne.s32.totalorder %s1936_s19, %s1932_s18 }
  0x11   : > { %s2942_s26 = smov (%p42_p0, %s40_s26), 0  ;;  %p61_p5 = scmp.eq.s32.totalorder %s2026_s24, 0 }
  0x12   : > { %2883 = sst [smem:[#allocation18_spill]] %s2942_s26  ;;  %p2038_p4 = por %p55_p2, %p54_p1 }
  0x13   : > { %s44_s29 = ssub.s32 %s1948_s22, %s2942_s26  ;;  %p140_p6 = scmp.eq.s32.totalorder %s2026_s24, 1 }
  0x14   : > { %p45_p7 = scmp.eq.s32.totalorder %s44_s29, 0  ;;  %p2046_p8 = por %p61_p5, %p60_p3 }
  0x15   : > { %p2050_p9 = por %p140_p6, %p54_p1  ;;  %p146_p10 = scmp.eq.s32.totalorder %s2854_s25, 1 }
  0x16   : > { %s2057_s7 = scalar_select %p45_p7, %s1940_s20, %s47_s27  }
  0x17   : > { %p2059_p11 = por %p146_p10, %p60_p3  ;;  %p1545_p13 = scmp.lt.s32.totalorder %s1952_s23, 2 }
  0x18   : > { %2887 = sst [smem:[#allocation19_spill]] %s2057_s7  ;;  %s2855_s9 = sand.u32 1, %s1940_s20  }
  0x19   : > { %s2888_s8 = scalar_select %p2059_p11, 1, 0 }
  0x1a   : > { %s2068_s10 = sshll.u32 %s2855_s9, 5  ;;  %s2071_s11 = sshll.u32 %s1948_s22, 9 }
  0x1b   : > { %2889 = sst [smem:[#allocation20_spill]] %s2888_s8  ;;  %p2075_p0 = pnand %p1545_p13, %p2038_p4 }
  0x1c   : > { %s243_s13 = sand.u32 1, %s1952_s23   ;;  %s2891_s1 = sld [smem:[#allocation39_spill]] }
  0x1d   : > { %s247_s17 = scalar_lea.vmem [#allocation5], %s2068_s10  ;;  %p1461_p1 = scmp.ge.s32.totalorder %s1952_s23, 1 }
  0x1e   : > { %s256_s27 = sshll.u32 %s247_s17, 4  ;;  %p285_p2 = scmp.lt.s32.totalorder %s1952_s23, 3  ;;  %s257_s27 = int_to_ptr.vmem [resolvable:$true] %s256_s27 }
  0x1f   : > { %s2087_s29 = scalar_lea.sflag [#allocation6], %s243_s13  ;;  %p1730_p3 = pneg %p2075_p0 }
  0x20   : > { %s1741_s28 = scalar_lea.vmem %s257_s27, 512  ;;  %s1954_s25 = smov [#allocation5]  }
  0x21   : > { %p1742_p4 = scmp.ne.s32.totalorder %s257_s27, %s1741_s28  ;;  %s1746_s9 = sshll.u32 %s1954_s25, 4  ;;  %s1747_s9 = int_to_ptr.vmem [resolvable:$false] %s1746_s9 }
  0x22   : > { %s255_s16 = scalar_lea.hbm %s2891_s1, %s2071_s11  ;;  %s1748_s14 = scalar_lea.vmem %s1747_s9, 1024 }
  0x23   : > { %p1744_p5 = pnand %p1742_p4, %p1730_p3  ;;  %p1749_p7 = scmp.lt.s32.totalorder %s257_s27, %s1747_s9 }
  0x24   : > { %p1750_p10 = scmp.lt.s32.totalorder %s1748_s14, %s1741_s28 }
  0x25   : > { %p1745_p6 = pneg %p1744_p5 }
  0x26   : > { %p1751_p13 = por %p1750_p10, %p1749_p7 }
  0x28   : > { %p1752_p12 = pnand %p1751_p13, %p1745_p6 }
  0x2a   : > { %1755 = shalt.err (!%p1752_p12)
}
  0x2b   : > { %s2860_s15 = smov 256   ;;  %s1956_s13 = smov 16  }
  0x2c   : > { %1531 = dma.hbm_to_vmem [thread:$0]  (!%p2075_p0), %s255_s16, 512, %s257_s27, %s2087_s29, %s2860_s15, %s2860_s15, %s1956_s13  }
  0x2d   : > { %p2104_p4 = pnand %p1461_p1, %p285_p2  ;;  %s232_s28 = scalar_lea.hbm %s2848_s0, %s2071_s11 }
  0x2e   : > { %s226_s14 = scalar_lea.vmem [#allocation2], %s2068_s10  ;;  %s276_s7 = scalar_lea.hbm %s2850_s2, %s2071_s11 }
  0x2f   : > { %s233_s1 = sshll.u32 %s226_s14, 4  ;;  %s2893_s8 = sand.u32 1, %s1940_s20   ;;  %s234_s1 = int_to_ptr.vmem [resolvable:$true] %s233_s1 }
  0x30   : > { %s223_s18 = scalar_lea.sflag [#allocation3], %s2893_s8  ;;  %s1769_s16 = scalar_lea.vmem %s234_s1, 512 }
  0x31   : > { %p1770_p12 = scmp.ne.s32.totalorder %s234_s1, %s1769_s16  ;;  %s1957_s27 = smov [#allocation2]  }
  0x32   : > { %s1774_s15 = sshll.u32 %s1957_s27, 4  ;;  %s1775_s15 = int_to_ptr.vmem [resolvable:$false] %s1774_s15 }
  0x33   : > { %p1772_p1 = pnand %p1770_p12, %p1730_p3  ;;  %s1776_s9 = scalar_lea.vmem %s1775_s15, 1024 }
  0x34   : > { %p1777_p5 = scmp.lt.s32.totalorder %s234_s1, %s1775_s15  ;;  %p1778_p6 = scmp.lt.s32.totalorder %s1776_s9, %s1769_s16 }
  0x35   : > { %p1773_p2 = pneg %p1772_p1 }
  0x36   : > { %p1779_p7 = por %p1778_p6, %p1777_p5 }
  0x38   : > { %p1780_p10 = pnand %p1779_p7, %p1773_p2 }
  0x3a   : > { %1783 = shalt.err (!%p1780_p10)
}
  0x3b   : > { %s2894_s22 = smov 256   ;;  %s270_s26 = scalar_lea.vmem [#allocation7], %s2068_s10 }
  0x3c   : > { %1528 = dma.hbm_to_vmem [thread:$0]  (!%p2075_p0), %s232_s28, 512, %s234_s1, %s223_s18, %s2894_s22, %s2894_s22, %s1956_s13  }
  0x3d   : > { %s277_s8 = sshll.u32 %s270_s26, 4  ;;  %s1958_s15 = smov [#allocation7]   ;;  %s278_s8 = int_to_ptr.vmem [resolvable:$true] %s277_s8 }
  0x3e   : > { %s1797_s17 = scalar_lea.vmem %s278_s8, 512  ;;  %s1802_s14 = sshll.u32 %s1958_s15, 4  ;;  %s1803_s14 = int_to_ptr.vmem [resolvable:$false] %s1802_s14 }
  0x3f   : > { %p1798_p13 = scmp.ne.s32.totalorder %s278_s8, %s1797_s17  ;;  %s1804_s16 = scalar_lea.vmem %s1803_s14, 1024 }
  0x40   : > { %p1805_p2 = scmp.lt.s32.totalorder %s278_s8, %s1803_s14  ;;  %p1806_p5 = scmp.lt.s32.totalorder %s1804_s16, %s1797_s17 }
  0x41   : > { %p1800_p12 = pnand %p1798_p13, %p1730_p3 }
  0x42   : > { %p1807_p6 = por %p1806_p5, %p1805_p2 }
  0x43   : > { %p1801_p1 = pneg %p1800_p12 }
  0x45   : > { %p1808_p7 = pnand %p1807_p6, %p1801_p1 }
  0x47   : > { %1811 = shalt.err (!%p1808_p7)
}
  0x48   : > { %1534 = dma.hbm_to_vmem [thread:$0]  (!%p2075_p0), %s276_s7, 512, %s278_s8, %s2087_s29, %s2894_s22, %s2894_s22, %s1956_s13  }
  0x49   : > { %289 = sbr.rel (%p2104_p4) target bundleno = 1097 (0x449), region = 32 }
  0x4e   : > { %s2145_s10 = sand.u32 1, %s1936_s19  }
  0x4f   : > { %s2148_s12 = sshll.u32 %s2145_s10, 5  ;;  %s292_s28 = scalar_lea.sflag [#allocation3], %s2145_s10 }
  0x50   : > { %s295_s27 = scalar_lea.vmem [#allocation2], %s2148_s12 }
  0x51   : > { %1915 = dma.done.wait (%p2046_p8), %s292_s28, 512  }
  0x52   : > { %1917 = vsyncadd (%p2046_p8), %s292_s28, 4294966784  ;;  %s300_s7 = sand.u32 1, %s2026_s24   ;;  %s304_s29 = scalar_lea.vmem [#allocation5], %s2148_s12 }
  0x53   : > { %s301_s11 = scalar_lea.sflag [#allocation6], %s300_s7 }
  0x54   : > { %1919 = dma.done.wait (%p2046_p8), %s301_s11, 1024  }
  0x55   : > { %1921 = vsyncadd (%p2046_p8), %s301_s11, 4294966272  ;;  %v1959_v0 = vmov 0.0   ;;  %v360_v1 = vld [vmem:[%s295_s27] sm:$0xff]  ;;  %v361_v2 = vld [vmem:[%s295_s27 + $0x8] sm:$0xff]  ;;  %vm436_vm0 = vcmask 130048   ;;  %s351_s13 = scalar_lea.vmem [#allocation9], %s2145_s10 }
  0x56   : > { %597 = vmatprep.mubr.f32.mxu0 %v1959_v0  ;;  %372 = vxpose.xlu0.b32.start [1/2] (short) %v360_v1, 128  ;;  %v367_v3 = vld [vmem:[%s304_s29 + $0x18] sm:$0xff]  ;;  %v366_v4 = vld [vmem:[%s304_s29 + $0x10] sm:$0xff]  ;;  %v365_v7 = vld [vmem:[%s304_s29 + $0x8] sm:$0xff]  ;;  %s2476_s25 = scalar_lea.vmem [#allocation7], %s2148_s12  ;;  %s1501_s9 = sshll.u32 %s1944_s21, 4 }
  0x57   : > { %404 = vxpose.xlu1.b32.start [1/2] (short) %v361_v2, 128  ;;  %v362_v5 = vld [vmem:[%s295_s27 + $0x10] sm:$0xff]  ;;  %v363_v6 = vld [vmem:[%s295_s27 + $0x18] sm:$0xff]  ;;  %561 = vmatprep.subr.mxu0 %v367_v3  ;;  %v364_v8 = vld [vmem:[%s304_s29] sm:$0xff]  ;;  %s1250_s8 = scalar_lea.hbm %s2852_s4, %s1501_s9  ;;  %s1252_s17 = sshll.u32 %s351_s13, 4  ;;  %s1253_s17 = int_to_ptr.vmem [resolvable:$true] %s1252_s17 }
  0x58   : > { %562 = vmatpush1.msra.mxu0 %v366_v4  ;;  %s2751_s15 = scalar_lea.sflag [#allocation10], %s300_s7  ;;  %s1812_s14 = scalar_lea.vmem %s1253_s17, 16 }
  0x59   : > { %563 = vmatprep.subr.mxu0 %v365_v7  ;;  %p1813_p8 = scmp.ne.s32.totalorder %s1253_s17, %s1812_s14  ;;  %s1960_s16 = smov [#allocation9]  }
  0x5a   : > { %373 = vxpose.xlu0.b32.end [2/2] (short) %v362_v5, 128  ;;  %564 = vmatpush1.msra.mxu0 %v364_v8  ;;  %s1816_s1 = sshll.u32 %s1960_s16, 4  ;;  %s1817_s1 = int_to_ptr.vmem [resolvable:$false] %s1816_s1 }
  0x5b   : > { %405 = vxpose.xlu1.b32.end [2/2] (short) %v363_v6, 128  ;;  %p1814_p0 = pnand %p1813_p8, %p2050_p9  ;;  %s1818_s18 = scalar_lea.vmem %s1817_s1, 32 }
  0x5c   : > { %p1819_p4 = scmp.lt.s32.totalorder %s1253_s17, %s1817_s1  ;;  %p1820_p10 = scmp.lt.s32.totalorder %s1818_s18, %s1812_s14 }
  0x5d   : > { %p1815_p3 = pneg %p1814_p0 }
  0x5e   : > { %p1821_p13 = por %p1820_p10, %p1819_p4 }
  0x60   : > { %p1822_p12 = pnand %p1821_p13, %p1815_p3 }
  0xd2   : > { %v388_v9 = vpop.trf.xlu0 }
  0xd3   : > { %1466 = vmatmul.mubr.msk.f32.vlgmr.msra.gmra.mxu0 %vm436_vm0, %v388_v9  ;;  %v420_v18 = vpop.trf.xlu1 }
  0xd4   : > { %603 = vmatprep.mubr.f32.mxu0 %v1959_v0 }
  0xd6   : > { %v389_v10 = vpop.trf.xlu0 }
  0xd7   : > { %1467 = vmatmul.mubr.msk.f32.gmra.mxu0 %vm436_vm0, %v389_v10  ;;  %v421_v20 = vpop.trf.xlu1 }
  0xd8   : > { %609 = vmatprep.mubr.f32.mxu0 %v1959_v0 }
  0xda   : > { %v390_v11 = vpop.trf.xlu0 }
  0xdb   : > { %1468 = vmatmul.mubr.msk.f32.gmra.mxu0 %vm436_vm0, %v390_v11  ;;  %v422_v23 = vpop.trf.xlu1 }
  0xdc   : > { %615 = vmatprep.mubr.f32.mxu0 %v1959_v0 }
  0xde   : > { %v391_v12 = vpop.trf.xlu0 }
  0xdf   : > { %1469 = vmatmul.mubr.msk.f32.gmra.mxu0 %vm436_vm0, %v391_v12  ;;  %v423_v25 = vpop.trf.xlu1 }
  0xe0   : > { %621 = vmatprep.mubr.f32.mxu0 %v1959_v0 }
  0xe2   : > { %v392_v13 = vpop.trf.xlu0 }
  0xe3   : > { %1470 = vmatmul.mubr.msk.f32.gmra.mxu0 %vm436_vm0, %v392_v13  ;;  %v424_v28 = vpop.trf.xlu1 }
  0xe4   : > { %627 = vmatprep.mubr.f32.mxu0 %v1959_v0 }
  0xe6   : > { %v393_v14 = vpop.trf.xlu0 }
  0xe7   : > { %1471 = vmatmul.mubr.msk.f32.gmra.mxu0 %vm436_vm0, %v393_v14  ;;  %v425_v30 = vpop.trf.xlu1 }
  0xe8   : > { %633 = vmatprep.mubr.f32.mxu0 %v1959_v0 }
  0xea   : > { %v394_v15 = vpop.trf.xlu0 }
  0xeb   : > { %1472 = vmatmul.mubr.msk.f32.gmra.mxu0 %vm436_vm0, %v394_v15  ;;  %v426_v31 = vpop.trf.xlu1 }
  0xec   : > { %639 = vmatprep.mubr.f32.mxu0 %v1959_v0 }
  0xee   : > { %v395_v16 = vpop.trf.xlu0 }
  0xef   : > { %1473 = vmatmul.mubr.msk.f32.gmra.mxu0 %vm436_vm0, %v395_v16  ;;  %v427_v32 = vpop.trf.xlu1 }
  0xf0   : > { %645 = vmatprep.mubr.f32.mxu0 %v1959_v0 }
  0xf2   : > { %v396_v17 = vpop.trf.xlu0 }
  0xf3   : > { %1474 = vmatmul.mubr.msk.f32.gmra.mxu0 %vm436_vm0, %v396_v17  ;;  %v428_v33 = vpop.trf.xlu1 }
  0xf4   : > { %651 = vmatprep.mubr.f32.mxu0 %v1959_v0 }
  0xf6   : > { %v397_v19 = vpop.trf.xlu0 }
  0xf7   : > { %1475 = vmatmul.mubr.msk.f32.gmra.mxu0 %vm436_vm0, %v397_v19  ;;  %v429_v34 = vpop.trf.xlu1 }
  0xf8   : > { %657 = vmatprep.mubr.f32.mxu0 %v1959_v0 }
  0xfa   : > { %v398_v21 = vpop.trf.xlu0 }
  0xfb   : > { %1476 = vmatmul.mubr.msk.f32.gmra.mxu0 %vm436_vm0, %v398_v21  ;;  %v430_v35 = vpop.trf.xlu1 }
  0xfc   : > { %663 = vmatprep.mubr.f32.mxu0 %v1959_v0 }
  0xfe   : > { %v399_v22 = vpop.trf.xlu0 }
  0xff   : > { %1477 = vmatmul.mubr.msk.f32.gmra.mxu0 %vm436_vm0, %v399_v22  ;;  %v431_v36 = vpop.trf.xlu1 }
 0x100   : > { %669 = vmatprep.mubr.f32.mxu0 %v1959_v0 }
 0x102   : > { %v400_v24 = vpop.trf.xlu0 }
 0x103   : > { %1478 = vmatmul.mubr.msk.f32.gmra.mxu0 %vm436_vm0, %v400_v24  ;;  %v432_v37 = vpop.trf.xlu1 }
 0x104   : > { %675 = vmatprep.mubr.f32.mxu0 %v1959_v0 }
 0x106   : > { %v401_v26 = vpop.trf.xlu0 }
 0x107   : > { %1479 = vmatmul.mubr.msk.f32.gmra.mxu0 %vm436_vm0, %v401_v26  ;;  %v433_v38 = vpop.trf.xlu1 }
 0x108   : > { %681 = vmatprep.mubr.f32.mxu0 %v1959_v0 }
 0x10a   : > { %v402_v27 = vpop.trf.xlu0 }
 0x10b   : > { %1480 = vmatmul.mubr.msk.f32.gmra.mxu0 %vm436_vm0, %v402_v27  ;;  %v434_v39 = vpop.trf.xlu1 }
 0x10c   : > { %687 = vmatprep.mubr.f32.mxu0 %v1959_v0 }
 0x10e   : > { %v403_v29 = vpop.trf.xlu0 }
 0x10f   : > { %1481 = vmatmul.mubr.msk.f32.gmra.mxu0 %vm436_vm0, %v403_v29  ;;  %v435_v40 = vpop.trf.xlu1 }
 0x110   : > { %693 = vmatprep.mubr.f32.mxu0 %v1959_v0 }
 0x113   : > { %1482 = vmatmul.mubr.msk.f32.gmra.mxu0 %vm436_vm0, %v420_v18 }
 0x114   : > { %699 = vmatprep.mubr.f32.mxu0 %v1959_v0 }
 0x117   : > { %1483 = vmatmul.mubr.msk.f32.gmra.mxu0 %vm436_vm0, %v421_v20 }
 0x118   : > { %705 = vmatprep.mubr.f32.mxu0 %v1959_v0 }
 0x11b   : > { %1484 = vmatmul.mubr.msk.f32.gmra.mxu0 %vm436_vm0, %v422_v23 }
 0x11c   : > { %711 = vmatprep.mubr.f32.mxu0 %v1959_v0 }
 0x11f   : > { %1485 = vmatmul.mubr.msk.f32.gmra.mxu0 %vm436_vm0, %v423_v25 }
 0x120   : > { %717 = vmatprep.mubr.f32.mxu0 %v1959_v0 }
 0x123   : > { %1486 = vmatmul.mubr.msk.f32.gmra.mxu0 %vm436_vm0, %v424_v28 }
 0x124   : > { %723 = vmatprep.mubr.f32.mxu0 %v1959_v0 }
 0x127   : > { %1487 = vmatmul.mubr.msk.f32.gmra.mxu0 %vm436_vm0, %v425_v30 }
 0x128   : > { %729 = vmatprep.mubr.f32.mxu0 %v1959_v0 }
 0x12b   : > { %1488 = vmatmul.mubr.msk.f32.gmra.mxu0 %vm436_vm0, %v426_v31 }
 0x12c   : > { %735 = vmatprep.mubr.f32.mxu0 %v1959_v0 }
 0x12f   : > { %1489 = vmatmul.mubr.msk.f32.gmra.mxu0 %vm436_vm0, %v427_v32 }
 0x130   : > { %741 = vmatprep.mubr.f32.mxu0 %v1959_v0 }
 0x133   : > { %1490 = vmatmul.mubr.msk.f32.gmra.mxu0 %vm436_vm0, %v428_v33 }
 0x134   : > { %747 = vmatprep.mubr.f32.mxu0 %v1959_v0 }
 0x137   : > { %1491 = vmatmul.mubr.msk.f32.gmra.mxu0 %vm436_vm0, %v429_v34 }
 0x138   : > { %753 = vmatprep.mubr.f32.mxu0 %v1959_v0 }
 0x13b   : > { %1492 = vmatmul.mubr.msk.f32.gmra.mxu0 %vm436_vm0, %v430_v35 }
 0x13c   : > { %759 = vmatprep.mubr.f32.mxu0 %v1959_v0 }
 0x13f   : > { %1493 = vmatmul.mubr.msk.f32.gmra.mxu0 %vm436_vm0, %v431_v36 }
 0x140   : > { %765 = vmatprep.mubr.f32.mxu0 %v1959_v0 }
 0x143   : > { %1494 = vmatmul.mubr.msk.f32.gmra.mxu0 %vm436_vm0, %v432_v37 }
 0x144   : > { %771 = vmatprep.mubr.f32.mxu0 %v1959_v0 }
 0x147   : > { %1495 = vmatmul.mubr.msk.f32.gmra.mxu0 %vm436_vm0, %v433_v38 }
 0x148   : > { %777 = vmatprep.mubr.f32.mxu0 %v1959_v0 }
 0x14b   : > { %1496 = vmatmul.mubr.msk.f32.gmra.mxu0 %vm436_vm0, %v434_v39 }
 0x14c   : > { %783 = vmatprep.mubr.f32.mxu0 %v1959_v0 }
 0x14f   : > { %1497 = vmatmul.mubr.msk.f32.gmra.mxu0 %vm436_vm0, %v435_v40 }
 0x193   : > { %v2228_v41 = vpop.f32.mrf.mxu0 }
 0x195   : > { %v2230_v42 = vpop.f32.mrf.mxu0 }
 0x197   : > { %v2232_v43 = vpop.f32.mrf.mxu0 }
 0x199   : > { %v2234_v44 = vpop.f32.mrf.mxu0 }
 0x19b   : > { %v2236_v45 = vpop.f32.mrf.mxu0 }
 0x19c   : > { %v790_v28 = vmax.f32 %v2228_v41, %v2236_v45 }
 0x19d   : > { %v2238_v46 = vpop.f32.mrf.mxu0 }
 0x19e   : > { %v791_v26 = vmax.f32 %v2230_v42, %v2238_v46 }
 0x19f   : > { %v2240_v47 = vpop.f32.mrf.mxu0 }
 0x1a0   : > { %v792_v29 = vmax.f32 %v2232_v43, %v2240_v47 }
 0x1a1   : > { %v2242_v48 = vpop.f32.mrf.mxu0 }
 0x1a2   : > { %v793_v30 = vmax.f32 %v2234_v44, %v2242_v48 }
 0x1a3   : > { %v2244_v49 = vpop.f32.mrf.mxu0 }
 0x1a4   : > { %v794_v33 = vmax.f32 %v790_v28, %v2244_v49 }
 0x1a5   : > { %v2246_v50 = vpop.f32.mrf.mxu0 }
 0x1a6   : > { %2895 = vst [vmem:[#allocation21_spill] sm:$0xff] %v2246_v50  ;;  %v795_v31 = vmax.f32 %v791_v26, %v2246_v50 }
 0x1a7   : > { %v2248_v51 = vpop.f32.mrf.mxu0 }
 0x1a8   : > { %v796_v34 = vmax.f32 %v792_v29, %v2248_v51 }
 0x1a9   : > { %v2250_v52 = vpop.f32.mrf.mxu0 }
 0x1aa   : > { %v797_v35 = vmax.f32 %v793_v30, %v2250_v52 }
 0x1ab   : > { %v2252_v53 = vpop.f32.mrf.mxu0 }
 0x1ac   : > { %v798_v38 = vmax.f32 %v794_v33, %v2252_v53 }
 0x1ad   : > { %v2254_v54 = vpop.f32.mrf.mxu0 }
 0x1ae   : > { %2896 = vst [vmem:[#allocation22_spill] sm:$0xff] %v2254_v54  ;;  %v799_v36 = vmax.f32 %v795_v31, %v2254_v54 }
 0x1af   : > { %v2256_v55 = vpop.f32.mrf.mxu0 }
 0x1b0   : > { %v800_v39 = vmax.f32 %v796_v34, %v2256_v55 }
 0x1b1   : > { %v2258_v56 = vpop.f32.mrf.mxu0 }
 0x1b2   : > { %v801_v40 = vmax.f32 %v797_v35, %v2258_v56 }
 0x1b3   : > { %v2260_v57 = vpop.f32.mrf.mxu0 }
 0x1b4   : > { %v802_v28 = vmax.f32 %v798_v38, %v2260_v57 }
 0x1b5   : > { %v2262_v58 = vpop.f32.mrf.mxu0 }
 0x1b6   : > { %2897 = vst [vmem:[#allocation23_spill] sm:$0xff] %v2262_v58  ;;  %v803_v26 = vmax.f32 %v799_v36, %v2262_v58 }
 0x1b7   : > { %v2264_v59 = vpop.f32.mrf.mxu0 }
 0x1b8   : > { %v804_v29 = vmax.f32 %v800_v39, %v2264_v59 }
 0x1b9   : > { %v2266_v60 = vpop.f32.mrf.mxu0 }
 0x1ba   : > { %2898 = vst [vmem:[#allocation24_spill] sm:$0xff] %v2266_v60  ;;  %v805_v30 = vmax.f32 %v801_v40, %v2266_v60 }
 0x1bb   : > { %v2268_v61 = vpop.f32.mrf.mxu0 }
 0x1bc   : > { %2899 = vst [vmem:[#allocation25_spill] sm:$0xff] %v2268_v61  ;;  %v806_v33 = vmax.f32 %v802_v28, %v2268_v61 }
 0x1bd   : > { %v2270_v62 = vpop.f32.mrf.mxu0 }
 0x1be   : > { %2900 = vst [vmem:[#allocation26_spill] sm:$0xff] %v2270_v62  ;;  %v807_v31 = vmax.f32 %v803_v26, %v2270_v62 }
 0x1bf   : > { %v2272_v63 = vpop.f32.mrf.mxu0 }
 0x1c0   : > { %v808_v34 = vmax.f32 %v804_v29, %v2272_v63 }
 0x1c1   : > { %v2274_v0 = vpop.f32.mrf.mxu0 }
 0x1c2   : > { %v809_v35 = vmax.f32 %v805_v30, %v2274_v0 }
 0x1c3   : > { %v2276_v1 = vpop.f32.mrf.mxu0 }
 0x1c4   : > { %v810_v38 = vmax.f32 %v806_v33, %v2276_v1 }
 0x1c5   : > { %v2278_v2 = vpop.f32.mrf.mxu0 }
 0x1c6   : > { %v811_v36 = vmax.f32 %v807_v31, %v2278_v2 }
 0x1c7   : > { %v2280_v3 = vpop.f32.mrf.mxu0 }
 0x1c8   : > { %v812_v39 = vmax.f32 %v808_v34, %v2280_v3 }
 0x1c9   : > { %v2282_v4 = vpop.f32.mrf.mxu0 }
 0x1ca   : > { %v813_v40 = vmax.f32 %v809_v35, %v2282_v4 }
 0x1cb   : > { %v2284_v5 = vpop.f32.mrf.mxu0 }
 0x1cc   : > { %v814_v28 = vmax.f32 %v810_v38, %v2284_v5 }
 0x1cd   : > { %v2286_v6 = vpop.f32.mrf.mxu0 }
 0x1ce   : > { %v815_v26 = vmax.f32 %v811_v36, %v2286_v6 }
 0x1cf   : > { %v2288_v7 = vpop.f32.mrf.mxu0 }
 0x1d0   : > { %v816_v29 = vmax.f32 %v812_v39, %v2288_v7 }
 0x1d1   : > { %v2290_v8 = vpop.f32.mrf.mxu0 }
 0x1d2   : > { %v817_v30 = vmax.f32 %v813_v40, %v2290_v8 }
 0x1d3   : > { %v2292_v9 = vpop.f32.mrf.mxu0 }
 0x1d4   : > { %v818_v33 = vmax.f32 %v814_v28, %v2292_v9 }
 0x1d5   : > { %v2294_v10 = vpop.f32.mrf.mxu0 }
 0x1d6   : > { %2901 = vst [vmem:[#allocation27_spill] sm:$0xff] %v2294_v10  ;;  %v819_v31 = vmax.f32 %v815_v26, %v2294_v10 }
 0x1d7   : > { %v2296_v11 = vpop.f32.mrf.mxu0 }
 0x1d8   : > { %v820_v34 = vmax.f32 %v816_v29, %v2296_v11 }
 0x1d9   : > { %v2298_v12 = vpop.f32.mrf.mxu0 }
 0x1da   : > { %v821_v35 = vmax.f32 %v817_v30, %v2298_v12 }
 0x1db   : > { %v2300_v13 = vpop.f32.mrf.mxu0 }
 0x1dc   : > { %v822_v38 = vmax.f32 %v818_v33, %v2300_v13 }
 0x1dd   : > { %v2302_v14 = vpop.f32.mrf.mxu0 }
 0x1de   : > { %2902 = vst [vmem:[#allocation28_spill] sm:$0xff] %v2302_v14  ;;  %v823_v36 = vmax.f32 %v819_v31, %v2302_v14 }
 0x1df   : > { %v2304_v15 = vpop.f32.mrf.mxu0 }
 0x1e0   : > { %v824_v39 = vmax.f32 %v820_v34, %v2304_v15 }
 0x1e1   : > { %v2306_v16 = vpop.f32.mrf.mxu0 }
 0x1e2   : > { %v825_v40 = vmax.f32 %v821_v35, %v2306_v16 }
 0x1e3   : > { %v2308_v17 = vpop.f32.mrf.mxu0 }
 0x1e4   : > { %v826_v28 = vmax.f32 %v822_v38, %v2308_v17 }
 0x1e5   : > { %v2310_v18 = vpop.f32.mrf.mxu0 }
 0x1e6   : > { %2903 = vst [vmem:[#allocation29_spill] sm:$0xff] %v2310_v18  ;;  %v827_v26 = vmax.f32 %v823_v36, %v2310_v18 }
 0x1e7   : > { %v2312_v19 = vpop.f32.mrf.mxu0 }
 0x1e8   : > { %2904 = vst [vmem:[#allocation30_spill] sm:$0xff] %v2312_v19  ;;  %v828_v29 = vmax.f32 %v824_v39, %v2312_v19 }
 0x1e9   : > { %v2314_v20 = vpop.f32.mrf.mxu0 }
 0x1ea   : > { %2905 = vst [vmem:[#allocation31_spill] sm:$0xff] %v2314_v20  ;;  %v829_v30 = vmax.f32 %v825_v40, %v2314_v20 }
 0x1eb   : > { %v2316_v21 = vpop.f32.mrf.mxu0 }
 0x1ec   : > { %2906 = vst [vmem:[#allocation32_spill] sm:$0xff] %v2316_v21  ;;  %v830_v33 = vmax.f32 %v826_v28, %v2316_v21 }
 0x1ed   : > { %v2318_v22 = vpop.f32.mrf.mxu0 }
 0x1ee   : > { %2907 = vst [vmem:[#allocation33_spill] sm:$0xff] %v2318_v22  ;;  %v831_v31 = vmax.f32 %v827_v26, %v2318_v22 }
 0x1ef   : > { %v2320_v23 = vpop.f32.mrf.mxu0 }
 0x1f0   : > { %2908 = vst [vmem:[#allocation34_spill] sm:$0xff] %v2320_v23  ;;  %v832_v34 = vmax.f32 %v828_v29, %v2320_v23 }
 0x1f1   : > { %v2322_v24 = vpop.f32.mrf.mxu0 }
 0x1f2   : > { %2909 = vst [vmem:[#allocation35_spill] sm:$0xff] %v2322_v24  ;;  %v833_v35 = vmax.f32 %v829_v30, %v2322_v24 }
 0x1f3   : > { %v2324_v25 = vpop.f32.mrf.mxu0 }
 0x1f4   : > { %2910 = vst [vmem:[#allocation36_spill] sm:$0xff] %v2324_v25  ;;  %v834_v38 = vmax.f32 %v830_v33, %v2324_v25 }
 0x1f5   : > { %v2328_v27 = vpop.f32.mrf.mxu0 }
 0x1f6   : > { %2911 = vst [vmem:[#allocation37_spill] sm:$0xff] %v2328_v27  ;;  %v835_v36 = vmax.f32 %v831_v31, %v2328_v27 }
 0x1f7   : > { %v2337_v32 = vpop.f32.mrf.mxu0 }
 0x1f8   : > { %v836_v39 = vmax.f32 %v832_v34, %v2337_v32 }
 0x1f9   : > { %v2343_v37 = vpop.f32.mrf.mxu0 }
 0x1fa   : > { %v837_v40 = vmax.f32 %v833_v35, %v2343_v37 }
 0x1fb   : > { %v2349_v50 = vpop.f32.mrf.mxu0 }
 0x1fc   : > { %v838_v28 = vmax.f32 %v834_v38, %v2349_v50 }
 0x1fd   : > { %v2355_v54 = vpop.f32.mrf.mxu0 }
 0x1fe   : > { %v839_v26 = vmax.f32 %v835_v36, %v2355_v54 }
 0x1ff   : > { %v2361_v58 = vpop.f32.mrf.mxu0 }
 0x200   : > { %v840_v29 = vmax.f32 %v836_v39, %v2361_v58 }
 0x201   : > { %v2367_v60 = vpop.f32.mrf.mxu0 }
 0x202   : > { %v841_v30 = vmax.f32 %v837_v40, %v2367_v60 }
 0x203   : > { %v2373_v61 = vpop.f32.mrf.mxu0 }
 0x204   : > { %v842_v33 = vmax.f32 %v838_v28, %v2373_v61 }
 0x205   : > { %v2379_v62 = vpop.f32.mrf.mxu0 }
 0x206   : > { %v843_v31 = vmax.f32 %v839_v26, %v2379_v62 }
 0x207   : > { %v2385_v10 = vpop.f32.mrf.mxu0 }
 0x208   : > { %v844_v34 = vmax.f32 %v840_v29, %v2385_v10 }
 0x209   : > { %v2391_v14 = vpop.f32.mrf.mxu0 }
 0x20a   : > { %v845_v35 = vmax.f32 %v841_v30, %v2391_v14 }
 0x20b   : > { %v2397_v18 = vpop.f32.mrf.mxu0 }
 0x20c   : > { %v846_v38 = vmax.f32 %v842_v33, %v2397_v18 }
 0x20d   : > { %v2403_v19 = vpop.f32.mrf.mxu0 }
 0x20e   : > { %v847_v36 = vmax.f32 %v843_v31, %v2403_v19 }
 0x20f   : > { %v2409_v20 = vpop.f32.mrf.mxu0 }
 0x210   : > { %v848_v39 = vmax.f32 %v844_v34, %v2409_v20  ;;  %v850_v22 = vmax.f32 %v846_v38, %v847_v36 }
 0x211   : > { %v2415_v21 = vpop.f32.mrf.mxu0 }
 0x212   : > { %v849_v40 = vmax.f32 %v845_v35, %v2415_v21 }
 0x214   : > { %v851_v26 = vmax.f32 %v848_v39, %v849_v40 }
 0x216   : > { %v852_v23 = vmax.f32 %v850_v22, %v851_v26 }
 0x218   : > { %853 = vmax.xlane.f32.xlu0 %v852_v23 }
 0x2a1   : > { %v854_v28 = vpop.xlane.xlu0 %853 }
 0x2a2   : > { %v855_v29 = vrot.slane %v854_v28, 4 }
 0x2a4   : > { %v856_v24 = vmax.f32 %v854_v28, %v855_v29 }
 0x2a6   : > { %v857_v30 = vrot.slane %v856_v24, 2 }
 0x2a8   : > { %v858_v25 = vmax.f32 %v856_v24, %v857_v30 }
 0x2aa   : > { %v859_v31 = vrot.slane %v858_v25, 1 }
 0x2ac   : > { %v860_v27 = vmax.f32 %v858_v25, %v859_v31 }
 0x2ae   : > { %1509 = vpush %v860_v27 }
 0x2df   : > { %s1510_s30 = spop %1509 }
 0x2e0   : > { %v2420_v33 = vstv %s1510_s30 }
 0x2e1   : > { %1208 = vst [vmem:[%s351_s13] sm:$0x1] %v2420_v33  ;;  %v863_v34 = vsub.f32 %v2228_v41, %v2420_v33  ;;  %v894_v22 = vsub.f32 %v2290_v8, %v2420_v33  ;;  %v864_v23 = vsub.f32 %v2230_v42, %v2420_v33  ;;  %v865_v25 = vsub.f32 %v2232_v43, %v2420_v33 }
 0x2e2   : > { %v866_v36 = vsub.f32 %v2234_v44, %v2420_v33  ;;  %v867_v41 = vsub.f32 %v2236_v45, %v2420_v33  ;;  %v893_v8 = vsub.f32 %v2288_v7, %v2420_v33  ;;  %v868_v42 = vsub.f32 %v2238_v46, %v2420_v33  ;;  %v2913_v46 = vld [vmem:[#allocation21_spill] sm:$0xff] }
 0x2e3   : > { %v989_v24 = vmul.f32 1.442695, %v894_v22  ;;  %v927_v35 = vmul.f32 1.442695, %v863_v34  ;;  %v929_v27 = vmul.f32 1.442695, %v864_v23  ;;  %v869_v43 = vsub.f32 %v2240_v47, %v2420_v33 }
 0x2e4   : > { %v931_v38 = vmul.f32 1.442695, %v865_v25  ;;  %v933_v39 = vmul.f32 1.442695, %v866_v36  ;;  %v935_v40 = vmul.f32 1.442695, %v867_v41  ;;  %v870_v44 = vsub.f32 %v2242_v48, %v2420_v33 }
 0x2e5   : > { %1600 = vpow2.f32 %v989_v24  ;;  %v987_v26 = vmul.f32 1.442695, %v893_v8  ;;  %v937_v28 = vmul.f32 1.442695, %v868_v42  ;;  %v871_v45 = vsub.f32 %v2244_v49, %v2420_v33  ;;  %v2914_v24 = vld [vmem:[#allocation22_spill] sm:$0xff] }
 0x2e6   : > { %1602 = vpow2.f32 %v927_v35  ;;  %v939_v7 = vmul.f32 1.442695, %v869_v43  ;;  %v872_v30 = vsub.f32 %v2913_v46, %v2420_v33  ;;  %v941_v47 = vmul.f32 1.442695, %v870_v44  ;;  %v369_v42 = vld [vmem:[%s2476_s25 + $0x8] sm:$0xff] }
 0x2e7   : > { %1604 = vpow2.f32 %v929_v27  ;;  %v873_v31 = vsub.f32 %v2248_v51, %v2420_v33  ;;  %v874_v34 = vsub.f32 %v2250_v52, %v2420_v33  ;;  %v943_v49 = vmul.f32 1.442695, %v871_v45  ;;  %1191 = vmatprep.mubr.f32.mxu1 %v369_v42 }
 0x2e8   : > { %1606 = vpow2.f32 %v931_v38  ;;  %v875_v23 = vsub.f32 %v2252_v53, %v2420_v33  ;;  %v876_v35 = vsub.f32 %v2914_v24, %v2420_v33  ;;  %v945_v25 = vmul.f32 1.442695, %v872_v30 }
 0x2e9   : > { %1608 = vpow2.f32 %v933_v39  ;;  %v877_v51 = vsub.f32 %v2256_v55, %v2420_v33  ;;  %v947_v27 = vmul.f32 1.442695, %v873_v31  ;;  %v878_v52 = vsub.f32 %v2258_v56, %v2420_v33  ;;  %v2915_v55 = vld [vmem:[#allocation23_spill] sm:$0xff] }
 0x2ea   : > { %1610 = vpow2.f32 %v987_v26  ;;  %v949_v36 = vmul.f32 1.442695, %v874_v34  ;;  %v879_v53 = vsub.f32 %v2260_v57, %v2420_v33  ;;  %v951_v8 = vmul.f32 1.442695, %v875_v23 }
 0x2eb   : > { %1612 = vpow2.f32 %v935_v40  ;;  %v880_v39 = vsub.f32 %v2915_v55, %v2420_v33  ;;  %v953_v43 = vmul.f32 1.442695, %v876_v35  ;;  %v881_v26 = vsub.f32 %v2264_v59, %v2420_v33 }
 0x2ec   : > { %1614 = vpow2.f32 %v937_v28  ;;  %v955_v44 = vmul.f32 1.442695, %v877_v51  ;;  %v892_v28 = vsub.f32 %v2286_v6, %v2420_v33  ;;  %v957_v45 = vmul.f32 1.442695, %v878_v52 }
 0x2ed   : > { %1616 = vpow2.f32 %v939_v7  ;;  %v891_v30 = vsub.f32 %v2284_v5, %v2420_v33  ;;  %v890_v59 = vsub.f32 %v2282_v4, %v2420_v33  ;;  %v961_v31 = vmul.f32 1.442695, %v880_v39 }
 0x2ee   : > { %1618 = vpow2.f32 %v941_v47  ;;  %v959_v47 = vmul.f32 1.442695, %v879_v53  ;;  %v963_v23 = vmul.f32 1.442695, %v881_v26  ;;  %v888_v5 = vsub.f32 %v2278_v2, %v2420_v33  ;;  %v2916_v53 = vld [vmem:[#allocation26_spill] sm:$0xff] }
 0x2ef   : > { %1620 = vpow2.f32 %v943_v49  ;;  %v889_v49 = vsub.f32 %v2280_v3, %v2420_v33  ;;  %v985_v24 = vmul.f32 1.442695, %v892_v28  ;;  %v887_v4 = vsub.f32 %v2276_v1, %v2420_v33 }
 0x2f0   : > { %1622 = vpow2.f32 %v945_v25  ;;  %v983_v51 = vmul.f32 1.442695, %v891_v30  ;;  %v981_v3 = vmul.f32 1.442695, %v890_v59  ;;  %v885_v2 = vsub.f32 %v2272_v63, %v2420_v33 }
 0x2f1   : > { %1624 = vpow2.f32 %v947_v27  ;;  %v886_v27 = vsub.f32 %v2274_v0, %v2420_v33  ;;  %v977_v1 = vmul.f32 1.442695, %v888_v5  ;;  %v2917_v0 = vld [vmem:[#allocation25_spill] sm:$0xff] }
 0x2f2   : > { %v2448_v29 = vpop.eup %1600  ;;  %1626 = vpow2.f32 %v949_v36  ;;  %v883_v39 = vsub.f32 %v2917_v0, %v2420_v33 }
 0x2f3   : > { %2912 = vst [vmem:[#allocation38_spill] sm:$0xff] %v2448_v29  ;;  %1127 = vmatprep.subr.mxu1 %v2448_v29  ;;  %v2455_v48 = vpop.eup %1602  ;;  %1628 = vpow2.f32 %v951_v8  ;;  %v884_v8 = vsub.f32 %v2916_v53, %v2420_v33  ;;  %v973_v63 = vmul.f32 1.442695, %v886_v27 }
 0x2f4   : > { %v2459_v22 = vpop.eup %1604  ;;  %1630 = vpow2.f32 %v953_v43  ;;  %v975_v43 = vmul.f32 1.442695, %v887_v4 }
 0x2f5   : > { %v1055_v41 = vadd.f32 %v2459_v22, %v2455_v48  ;;  %v2471_v38 = vpop.eup %1606  ;;  %1632 = vpow2.f32 %v955_v44  ;;  %v969_v30 = vmul.f32 1.442695, %v884_v8 }
 0x2f6   : > { %v2482_v40 = vpop.eup %1608  ;;  %1634 = vpow2.f32 %v957_v45  ;;  %v971_v45 = vmul.f32 1.442695, %v885_v2 }
 0x2f7   : > { %v1056_v56 = vadd.f32 %v2471_v38, %v1055_v41  ;;  %v2486_v57 = vpop.eup %1610  ;;  %1636 = vpow2.f32 %v959_v47  ;;  %v979_v41 = vmul.f32 1.442695, %v889_v49 }
 0x2f8   : > { %v2491_v46 = vpop.eup %1612  ;;  %1128 = vmatpush1.msra.mxu1 %v2486_v57  ;;  %1638 = vpow2.f32 %v961_v31  ;;  %v967_v31 = vmul.f32 1.442695, %v883_v39  ;;  %v2919_v39 = vld [vmem:[#allocation27_spill] sm:$0xff] }
 0x2f9   : > { %v1057_v7 = vadd.f32 %v2482_v40, %v1056_v56  ;;  %v2499_v34 = vpop.eup %1614  ;;  %1640 = vpow2.f32 %v963_v23  ;;  %v2918_v56 = vld [vmem:[#allocation24_spill] sm:$0xff] }
 0x2fa   : > { %v2506_v25 = vpop.eup %1616  ;;  %1642 = vpow2.f32 %v985_v24  ;;  %v882_v26 = vsub.f32 %v2918_v56, %v2420_v33 }
 0x2fb   : > { %v1058_v6 = vadd.f32 %v2491_v46, %v1057_v7  ;;  %v2513_v36 = vpop.eup %1618  ;;  %1644 = vpow2.f32 %v983_v51 }
 0x2fc   : > { %v2520_v55 = vpop.eup %1620  ;;  %1646 = vpow2.f32 %v981_v3  ;;  %v965_v49 = vmul.f32 1.442695, %v882_v26 }
 0x2fd   : > { %v1059_v35 = vadd.f32 %v2499_v34, %v1058_v6  ;;  %v2527_v28 = vpop.eup %1622  ;;  %1648 = vpow2.f32 %v979_v41 }
 0x2fe   : > { %v2529_v7 = vpop.eup %1624  ;;  %1650 = vpow2.f32 %v977_v1 }
 0x2ff   : > { %v1060_v52 = vadd.f32 %v2506_v25, %v1059_v35  ;;  %v2532_v59 = vpop.eup %1626  ;;  %1652 = vpow2.f32 %v975_v43  ;;  %v896_v43 = vsub.f32 %v2919_v39, %v2420_v33 }
 0x300   : > { %v2534_v6 = vpop.eup %1628  ;;  %1654 = vpow2.f32 %v973_v63  ;;  %v897_v63 = vsub.f32 %v2296_v11, %v2420_v33 }
 0x301   : > { %v1061_v42 = vadd.f32 %v2513_v36, %v1060_v52  ;;  %v2537_v5 = vpop.eup %1630  ;;  %1656 = vpow2.f32 %v971_v45 }
 0x302   : > { %v2539_v24 = vpop.eup %1632  ;;  %1658 = vpow2.f32 %v969_v30 }
 0x303   : > { %v1062_v44 = vadd.f32 %v2520_v55, %v1061_v42  ;;  %v2542_v4 = vpop.eup %1634  ;;  %1660 = vpow2.f32 %v967_v31  ;;  %v895_v42 = vsub.f32 %v2292_v9, %v2420_v33  ;;  %v898_v9 = vsub.f32 %v2298_v12, %v2420_v33 }
 0x304   : > { %v2544_v51 = vpop.eup %1636  ;;  %1662 = vpow2.f32 %v965_v49  ;;  %v2920_v49 = vld [vmem:[#allocation28_spill] sm:$0xff] }
 0x305   : > { %v1063_v47 = vadd.f32 %v2527_v28, %v1062_v44  ;;  %v1639_v3 = vpop.eup %1638  ;;  %v991_v31 = vmul.f32 1.442695, %v895_v42  ;;  %v997_v42 = vmul.f32 1.442695, %v898_v9 }
 0x306   : > { %v1641_v52 = vpop.eup %1640 }
 0x307   : > { %v1064_v23 = vadd.f32 %v2529_v7, %v1063_v47  ;;  %v2548_v41 = vpop.eup %1642  ;;  %v899_v47 = vsub.f32 %v2300_v13, %v2420_v33  ;;  %v902_v13 = vsub.f32 %v2306_v16, %v2420_v33  ;;  %1664 = vpow2.f32 %v991_v31 }
 0x308   : > { %v2550_v53 = vpop.eup %1644  ;;  %1129 = vmatprep.subr.mxu1 %v2548_v41  ;;  %v925_v16 = vsub.f32 %v2409_v20, %v2420_v33  ;;  %v922_v20 = vsub.f32 %v2391_v14, %v2420_v33 }
 0x309   : > { %v1065_v35 = vadd.f32 %v2532_v59, %v1064_v23  ;;  %v2554_v1 = vpop.eup %1646  ;;  %1130 = vmatpush1.msra.mxu1 %v2550_v53  ;;  %v900_v23 = vsub.f32 %v2920_v49, %v2420_v33  ;;  %v999_v49 = vmul.f32 1.442695, %v899_v47 }
 0x30a   : > { %v2559_v0 = vpop.eup %1648  ;;  %1131 = vmatprep.subr.mxu1 %v2554_v1 }
 0x30b   : > { %v1066_v27 = vadd.f32 %v2534_v6, %v1065_v35  ;;  %v2565_v26 = vpop.eup %1650  ;;  %1132 = vmatpush1.msra.mxu1 %v2559_v0  ;;  %v993_v35 = vmul.f32 1.442695, %v896_v43  ;;  %v903_v43 = vsub.f32 %v2308_v17, %v2420_v33  ;;  %v1005_v17 = vmul.f32 1.442695, %v902_v13  ;;  %v2923_v13 = vld [vmem:[#allocation35_spill] sm:$0xff] }
 0x30c   : > { %v2570_v44 = vpop.eup %1652  ;;  %1133 = vmatprep.subr.mxu1 %v2565_v26 }
 0x30d   : > { %v1067_v2 = vadd.f32 %v2537_v5, %v1066_v27  ;;  %v2576_v30 = vpop.eup %1654  ;;  %1134 = vmatpush1.msra.mxu1 %v2570_v44  ;;  %1666 = vpow2.f32 %v993_v35  ;;  %v1007_v31 = vmul.f32 1.442695, %v903_v43  ;;  %v1045_v35 = vmul.f32 1.442695, %v922_v20  ;;  %v2924_v43 = vld [vmem:[#allocation34_spill] sm:$0xff] }
 0x30e   : > { %v1657_v11 = vpop.eup %1656  ;;  %1135 = vmatprep.subr.mxu1 %v2576_v30 }
 0x30f   : > { %v1068_v8 = vadd.f32 %v2539_v24, %v1067_v2  ;;  %v1659_v27 = vpop.eup %1658  ;;  %v901_v2 = vsub.f32 %v2304_v15, %v2420_v33  ;;  %1136 = vmatpush1.msra.mxu1 %v1657_v11  ;;  %v1001_v15 = vmul.f32 1.442695, %v900_v23 }
 0x310   : > { %v1661_v39 = vpop.eup %1660  ;;  %1137 = vmatprep.subr.mxu1 %v1659_v27 }
 0x311   : > { %v1069_v56 = vadd.f32 %v2542_v4, %v1068_v8  ;;  %v995_v8 = vmul.f32 1.442695, %v897_v63  ;;  %v1663_v29 = vpop.eup %1662  ;;  %1138 = vmatpush1.msra.mxu1 %v1661_v39  ;;  %v1003_v9 = vmul.f32 1.442695, %v901_v2 }
 0x312   : > { %1139 = vmatprep.subr.mxu1 %v1663_v29 }
 0x313   : > { %v1070_v45 = vadd.f32 %v2544_v51, %v1069_v56  ;;  %1668 = vpow2.f32 %v995_v8  ;;  %1140 = vmatpush1.msra.mxu1 %v1641_v52  ;;  %v2922_v8 = vld [vmem:[#allocation36_spill] sm:$0xff] }
 0x314   : > { %1670 = vpow2.f32 %v997_v42  ;;  %1141 = vmatprep.subr.mxu1 %v1639_v3  ;;  %v910_v42 = vsub.f32 %v2923_v13, %v2420_v33 }
 0x315   : > { %v1071_v12 = vadd.f32 %v1639_v3, %v1070_v45  ;;  %v926_v45 = vsub.f32 %v2415_v21, %v2420_v33  ;;  %v923_v21 = vsub.f32 %v2397_v18, %v2420_v33  ;;  %1672 = vpow2.f32 %v999_v49  ;;  %1142 = vmatpush1.msra.mxu1 %v2544_v51 }
 0x316   : > { %1674 = vpow2.f32 %v1001_v15  ;;  %1143 = vmatprep.subr.mxu1 %v2542_v4  ;;  %v1051_v3 = vmul.f32 1.442695, %v925_v16  ;;  %v920_v18 = vsub.f32 %v2379_v62, %v2420_v33  ;;  %v919_v51 = vsub.f32 %v2373_v61, %v2420_v33  ;;  %v2925_v15 = vld [vmem:[#allocation33_spill] sm:$0xff] }
 0x317   : > { %v1072_v56 = vadd.f32 %v1641_v52, %v1071_v12  ;;  %v924_v12 = vsub.f32 %v2403_v19, %v2420_v33  ;;  %v921_v19 = vsub.f32 %v2385_v10, %v2420_v33  ;;  %1676 = vpow2.f32 %v1003_v9  ;;  %1144 = vmatpush1.msra.mxu1 %v2539_v24  ;;  %v2926_v9 = vld [vmem:[#allocation32_spill] sm:$0xff] }
 0x318   : > { %1678 = vpow2.f32 %v1005_v17  ;;  %1145 = vmatprep.subr.mxu1 %v2537_v5  ;;  %v1047_v4 = vmul.f32 1.442695, %v923_v21  ;;  %v918_v10 = vsub.f32 %v2367_v60, %v2420_v33  ;;  %v917_v5 = vsub.f32 %v2361_v58, %v2420_v33  ;;  %v2625_v58 = vpop.eup %1664 }
 0x319   : > { %v1073_v63 = vadd.f32 %v1663_v29, %v1072_v56  ;;  %v1053_v29 = vmul.f32 1.442695, %v926_v45  ;;  %v1049_v23 = vmul.f32 1.442695, %v924_v12  ;;  %1680 = vpow2.f32 %v1007_v31  ;;  %1146 = vmatpush1.msra.mxu1 %v2534_v6 }
 0x31a   : > { %1147 = vmatprep.subr.mxu1 %v2532_v59  ;;  %v1043_v24 = vmul.f32 1.442695, %v921_v19  ;;  %v916_v61 = vsub.f32 %v2355_v54, %v2420_v33  ;;  %v1041_v6 = vmul.f32 1.442695, %v920_v18  ;;  %v915_v59 = vsub.f32 %v2349_v50, %v2420_v33 }
 0x31b   : > { %v1074_v47 = vadd.f32 %v1661_v39, %v1073_v63  ;;  %1682 = vpow2.f32 %v1053_v29  ;;  %1148 = vmatpush1.msra.mxu1 %v2529_v7  ;;  %v914_v7 = vsub.f32 %v2343_v37, %v2420_v33  ;;  %v913_v50 = vsub.f32 %v2337_v32, %v2420_v33 }
 0x31c   : > { %1684 = vpow2.f32 %v1051_v3  ;;  %1149 = vmatprep.subr.mxu1 %v2527_v28  ;;  %v2631_v28 = vpop.eup %1666  ;;  %v1033_v2 = vmul.f32 1.442695, %v916_v61  ;;  %v911_v32 = vsub.f32 %v2922_v8, %v2420_v33  ;;  %v1031_v39 = vmul.f32 1.442695, %v915_v59 }
 0x31d   : > { %v1075_v52 = vadd.f32 %v1659_v27, %v1074_v47  ;;  %1686 = vpow2.f32 %v1049_v23  ;;  %1150 = vmatpush1.msra.mxu1 %v2520_v55  ;;  %v2921_v27 = vld [vmem:[#allocation37_spill] sm:$0xff]  ;;  %v1029_v56 = vmul.f32 1.442695, %v914_v7  ;;  %v909_v49 = vsub.f32 %v2924_v43, %v2420_v33  ;;  %v2927_v47 = vld [vmem:[#allocation31_spill] sm:$0xff] }
 0x31e   : > { %1688 = vpow2.f32 %v1047_v4  ;;  %1151 = vmatprep.subr.mxu1 %v2513_v36  ;;  %v912_v37 = vsub.f32 %v2921_v27, %v2420_v33  ;;  %v1027_v45 = vmul.f32 1.442695, %v913_v50  ;;  %v908_v63 = vsub.f32 %v2925_v15, %v2420_v33 }
 0x31f   : > { %v1076_v14 = vadd.f32 %v1657_v11, %v1075_v52  ;;  %v1037_v11 = vmul.f32 1.442695, %v918_v10  ;;  %1690 = vpow2.f32 %v1045_v35  ;;  %1152 = vmatpush1.msra.mxu1 %v2506_v25  ;;  %v907_v12 = vsub.f32 %v2926_v9, %v2420_v33  ;;  %v2930_v10 = vld [vmem:[#allocation38_spill] sm:$0xff] }
 0x320   : > { %1692 = vpow2.f32 %v1043_v24  ;;  %v2636_v55 = vpop.eup %1668  ;;  %1153 = vmatprep.subr.mxu1 %v2499_v34  ;;  %v1025_v16 = vmul.f32 1.442695, %v912_v37  ;;  %v1023_v17 = vmul.f32 1.442695, %v911_v32  ;;  %v906_v21 = vsub.f32 %v2927_v47, %v2420_v33 }
 0x321   : > { %v1077_v62 = vadd.f32 %v2576_v30, %v1076_v14  ;;  %v1039_v30 = vmul.f32 1.442695, %v919_v51  ;;  %1694 = vpow2.f32 %v1041_v6  ;;  %1154 = vmatpush1.msra.mxu1 %v2491_v46  ;;  %v1021_v31 = vmul.f32 1.442695, %v910_v42 }
 0x322   : > { %1155 = vmatprep.subr.mxu1 %v2482_v40  ;;  %v1019_v52 = vmul.f32 1.442695, %v909_v49  ;;  %v1017_v18 = vmul.f32 1.442695, %v908_v63  ;;  %v1013_v4 = vmul.f32 1.442695, %v906_v21 }
 0x323   : > { %v1078_v60 = vadd.f32 %v2570_v44, %v1077_v62  ;;  %v1035_v44 = vmul.f32 1.442695, %v917_v5  ;;  %1696 = vpow2.f32 %v1039_v30  ;;  %1156 = vmatpush1.msra.mxu1 %v2471_v38 }
 0x324   : > { %1698 = vpow2.f32 %v1037_v11  ;;  %1157 = vmatprep.subr.mxu1 %v2459_v22  ;;  %v2928_v22 = vld [vmem:[#allocation30_spill] sm:$0xff] }
 0x325   : > { %v1079_v54 = vadd.f32 %v2565_v26, %v1078_v60  ;;  %v2642_v26 = vpop.eup %1670  ;;  %1700 = vpow2.f32 %v1035_v44  ;;  %1158 = vmatpush1.msra.mxu1 %v2455_v48  ;;  %v905_v29 = vsub.f32 %v2928_v22, %v2420_v33  ;;  %v2929_v48 = vld [vmem:[#allocation29_spill] sm:$0xff] }
 0x326   : > { %v2647_v25 = vpop.eup %1672  ;;  %1702 = vpow2.f32 %v1033_v2  ;;  %v904_v3 = vsub.f32 %v2929_v48, %v2420_v33 }
 0x327   : > { %v1080_v36 = vadd.f32 %v2559_v0, %v1079_v54  ;;  %v2653_v0 = vpop.eup %1674  ;;  %1704 = vpow2.f32 %v1031_v39  ;;  %v1011_v62 = vmul.f32 1.442695, %v905_v29 }
 0x328   : > { %v2658_v46 = vpop.eup %1676  ;;  %1706 = vpow2.f32 %v1029_v56  ;;  %v1009_v5 = vmul.f32 1.442695, %v904_v3 }
 0x329   : > { %v1081_v34 = vadd.f32 %v2554_v1, %v1080_v36  ;;  %v2664_v1 = vpop.eup %1678  ;;  %1708 = vpow2.f32 %v1027_v45 }
 0x32a   : > { %v2669_v38 = vpop.eup %1680  ;;  %1710 = vpow2.f32 %v1025_v16 }
 0x32b   : > { %v1082_v40 = vadd.f32 %v2550_v53, %v1081_v34  ;;  %v2674_v20 = vpop.eup %1682  ;;  %1712 = vpow2.f32 %v1023_v17 }
 0x32c   : > { %v2678_v19 = vpop.eup %1684  ;;  %1159 = vmatprep.subr.mxu1 %v2674_v20  ;;  %1714 = vpow2.f32 %v1021_v31 }
 0x32d   : > { %v1083_v53 = vadd.f32 %v2548_v41, %v1082_v40  ;;  %v2684_v14 = vpop.eup %1686  ;;  %v1015_v41 = vmul.f32 1.442695, %v907_v12  ;;  %1160 = vmatpush2.msra.mxu1 %v2678_v19  ;;  %1716 = vpow2.f32 %v1019_v52  ;;  %v368_v12 = vld [vmem:[%s2476_s25] sm:$0xff] }
 0x32e   : > { %v2687_v51 = vpop.eup %1688  ;;  %1161 = vmatprep.subr.mxu1 %v2684_v14  ;;  %1718 = vpow2.f32 %v1017_v18 }
 0x32f   : > { %v1084_v23 = vadd.f32 %v2486_v57, %v1083_v53  ;;  %v2691_v33 = vpop.eup %1690  ;;  %1162 = vmatpush2.msra.mxu1 %v2687_v51  ;;  %1720 = vpow2.f32 %v1015_v41 }
 0x330   : > { %v2694_v57 = vpop.eup %1692  ;;  %1163 = vmatprep.subr.mxu1 %v2691_v33  ;;  %1722 = vpow2.f32 %v1013_v4 }
 0x331   : > { %v1085_v35 = vadd.f32 %v2930_v10, %v1084_v23  ;;  %v2698_v61 = vpop.eup %1694  ;;  %1164 = vmatpush2.msra.mxu1 %v2694_v57  ;;  %1724 = vpow2.f32 %v1011_v62 }
 0x332   : > { %v2701_v6 = vpop.eup %1696  ;;  %1165 = vmatprep.subr.mxu1 %v2698_v61  ;;  %1726 = vpow2.f32 %v1009_v5 }
 0x333   : > { %v1086_v24 = vadd.f32 %v2625_v58, %v1085_v35  ;;  %v2705_v59 = vpop.eup %1698  ;;  %1166 = vmatpush2.msra.mxu1 %v2701_v6 }
 0x334   : > { %v2708_v30 = vpop.eup %1700  ;;  %1167 = vmatprep.subr.mxu1 %v2705_v59 }
 0x335   : > { %v1087_v60 = vadd.f32 %v2631_v28, %v1086_v24  ;;  %v1703_v11 = vpop.eup %1702  ;;  %1168 = vmatpush2.msra.mxu1 %v2708_v30 }
 0x336   : > { %v1705_v54 = vpop.eup %1704  ;;  %1169 = vmatprep.subr.mxu1 %v1703_v11 }
 0x337   : > { %v1088_v7 = vadd.f32 %v2636_v55, %v1087_v60  ;;  %v1707_v44 = vpop.eup %1706  ;;  %1170 = vmatpush2.msra.mxu1 %v1705_v54 }
 0x338   : > { %v1709_v27 = vpop.eup %1708  ;;  %1171 = vmatprep.subr.mxu1 %v1707_v44 }
 0x339   : > { %v1089_v50 = vadd.f32 %v2642_v26, %v1088_v7  ;;  %v1711_v2 = vpop.eup %1710  ;;  %1172 = vmatpush2.msra.mxu1 %v1709_v27 }
 0x33a   : > { %v1713_v36 = vpop.eup %1712  ;;  %1173 = vmatprep.subr.mxu1 %v1711_v2 }
 0x33b   : > { %v1090_v37 = vadd.f32 %v2647_v25, %v1089_v50  ;;  %v1715_v32 = vpop.eup %1714  ;;  %1174 = vmatpush2.msra.mxu1 %v1713_v36 }
 0x33c   : > { %v1717_v39 = vpop.eup %1716  ;;  %1175 = vmatprep.subr.mxu1 %v1715_v32 }
 0x33d   : > { %v1091_v8 = vadd.f32 %v2653_v0, %v1090_v37  ;;  %v1719_v42 = vpop.eup %1718  ;;  %1176 = vmatpush2.msra.mxu1 %v1717_v39 }
 0x33e   : > { %v1721_v56 = vpop.eup %1720  ;;  %1177 = vmatprep.subr.mxu1 %v1719_v42 }
 0x33f   : > { %v1092_v13 = vadd.f32 %v2658_v46, %v1091_v8  ;;  %v1723_v43 = vpop.eup %1722  ;;  %1178 = vmatpush2.msra.mxu1 %v1721_v56 }
 0x340   : > { %v1725_v49 = vpop.eup %1724  ;;  %1179 = vmatprep.subr.mxu1 %v1723_v43 }
 0x341   : > { %v1093_v34 = vadd.f32 %v2664_v1, %v1092_v13  ;;  %v1727_v15 = vpop.eup %1726  ;;  %1180 = vmatpush2.msra.mxu1 %v1725_v49 }
 0x342   : > { %1181 = vmatprep.subr.mxu1 %v1727_v15 }
 0x343   : > { %v1094_v45 = vadd.f32 %v2669_v38, %v1093_v34  ;;  %1182 = vmatpush2.msra.mxu1 %v2669_v38  ;;  %v371_v38 = vld [vmem:[%s2476_s25 + $0x18] sm:$0xff] }
 0x344   : > { %1183 = vmatprep.subr.mxu1 %v2664_v1 }
 0x345   : > { %v1095_v63 = vadd.f32 %v1727_v15, %v1094_v45  ;;  %1184 = vmatpush2.msra.mxu1 %v2658_v46  ;;  %v370_v46 = vld [vmem:[%s2476_s25 + $0x10] sm:$0xff] }
 0x346   : > { %1185 = vmatprep.subr.mxu1 %v2653_v0 }
 0x347   : > { %v1096_v16 = vadd.f32 %v1725_v49, %v1095_v63  ;;  %1186 = vmatpush2.msra.mxu1 %v2647_v25 }
 0x348   : > { %1187 = vmatprep.subr.mxu1 %v2642_v26 }
 0x349   : > { %v1097_v40 = vadd.f32 %v1723_v43, %v1096_v16  ;;  %1188 = vmatpush2.msra.mxu1 %v2636_v55 }
 0x34a   : > { %1189 = vmatprep.subr.mxu1 %v2631_v28 }
 0x34b   : > { %v1098_v9 = vadd.f32 %v1721_v56, %v1097_v40  ;;  %1190 = vmatpush2.msra.mxu1 %v2625_v58 }
 0x34c   : > { %1192 = vmatmul.mubr.f32.vlgmr.msra.gmra.mxu1 %v368_v12 }
 0x34d   : > { %v1099_v17 = vadd.f32 %v1719_v42, %v1098_v9  ;;  %1197 = vmatprep.mubr.f32.mxu1 %v371_v38 }
 0x34f   : > { %v1100_v1 = vadd.f32 %v1717_v39, %v1099_v17 }
 0x350   : > { %1198 = vmatmul.mubr.f32.gmra.mxu1 %v370_v46 }
 0x351   : > { %v1101_v47 = vadd.f32 %v1715_v32, %v1100_v1 }
 0x353   : > { %v1102_v0 = vadd.f32 %v1713_v36, %v1101_v47 }
 0x355   : > { %v1103_v25 = vadd.f32 %v1711_v2, %v1102_v0 }
 0x357   : > { %v1104_v21 = vadd.f32 %v1709_v27, %v1103_v25 }
 0x359   : > { %v1105_v26 = vadd.f32 %v1707_v44, %v1104_v21 }
 0x35b   : > { %v1106_v55 = vadd.f32 %v1705_v54, %v1105_v26 }
 0x35d   : > { %v1107_v31 = vadd.f32 %v1703_v11, %v1106_v55 }
 0x35f   : > { %v1108_v28 = vadd.f32 %v2708_v30, %v1107_v31 }
 0x361   : > { %v1109_v58 = vadd.f32 %v2705_v59, %v1108_v28 }
 0x363   : > { %v1110_v53 = vadd.f32 %v2701_v6, %v1109_v58 }
 0x365   : > { %v1111_v22 = vadd.f32 %v2698_v61, %v1110_v53 }
 0x367   : > { %v1112_v29 = vadd.f32 %v2694_v57, %v1111_v22 }
 0x369   : > { %v1113_v52 = vadd.f32 %v2691_v33, %v1112_v29 }
 0x36b   : > { %v1114_v48 = vadd.f32 %v2687_v51, %v1113_v52 }
 0x36d   : > { %v1115_v3 = vadd.f32 %v2684_v14, %v1114_v48 }
 0x36f   : > { %v1116_v18 = vadd.f32 %v2678_v19, %v1115_v3 }
 0x371   : > { %v1117_v23 = vadd.f32 %v2674_v20, %v1116_v18 }
 0x373   : > { %1118 = vadd.xlane.f32.xlu1 %v1117_v23 }
 0x374   : > { %1825 = shalt.err (!%p1822_p12)
}
 0x375   : > { %s1826_s28 = scalar_lea.hbm %s1250_s8, 16  ;;  %s1830_s7 = scalar_lea.hbm %s2852_s4, 32 }
 0x376   : > { %p1827_p1 = scmp.ne.s32.totalorder %s1250_s8, %s1826_s28  ;;  %p1831_p6 = scmp.lt.s32.totalorder %s1250_s8, %s2852_s4 }
 0x377   : > { %p1832_p7 = scmp.lt.s32.totalorder %s1830_s7, %s1826_s28 }
 0x378   : > { %p1828_p2 = pnand %p1827_p1, %p2050_p9 }
 0x379   : > { %p1833_p8 = por %p1832_p7, %p1831_p6 }
 0x37a   : > { %p1829_p5 = pneg %p1828_p2 }
 0x37c   : > { %p1834_p0 = pnand %p1833_p8, %p1829_p5 }
 0x37e   : > { %1837 = shalt.err (!%p1834_p0)
}
 0x37f   : > { %1520 = dma.vmem_to_hbm [thread:$0]  (%p2050_p9), %s1253_s17, 16, %s1250_s8, %s2751_s15  }
 0x380   : > { %s345_s30 = scalar_lea.vmem [#allocation8], %s2148_s12  ;;  %s1508_s25 = sshll.u32 %s1944_s21, 9 }
 0x381   : > { %s1235_s13 = sshll.u32 %s345_s30, 4  ;;  %s2773_s8 = scalar_lea.hbm %s2851_s3, %s1508_s25  ;;  %s2768_s13 = int_to_ptr.vmem [resolvable:$true] %s1235_s13 }
 0x382   : > { %s1212_s12 = scalar_lea.sflag [#allocation4], %s2145_s10  ;;  %s1838_s17 = scalar_lea.vmem %s2768_s13, 512 }
 0x383   : > { %p1839_p3 = scmp.ne.s32.totalorder %s2768_s13, %s1838_s17  ;;  %s1961_s14 = smov [#allocation8]  }
 0x384   : > { %s1842_s16 = sshll.u32 %s1961_s14, 4  ;;  %s1843_s16 = int_to_ptr.vmem [resolvable:$false] %s1842_s16 }
 0x385   : > { %p1840_p4 = pnand %p1839_p3, %p2050_p9  ;;  %s1844_s1 = scalar_lea.vmem %s1843_s16, 1024 }
 0x386   : > { %p1845_p13 = scmp.lt.s32.totalorder %s2768_s13, %s1843_s16  ;;  %p1846_p12 = scmp.lt.s32.totalorder %s1844_s1, %s1838_s17 }
 0x387   : > { %p1841_p10 = pneg %p1840_p4 }
 0x388   : > { %p1847_p1 = por %p1846_p12, %p1845_p13 }
 0x38a   : > { %p1848_p2 = pnand %p1847_p1, %p1841_p10 }
 0x3fc   : > { %v1119_v20 = vpop.xlane.xlu1 %1118 }
 0x3fd   : > { %v1120_v19 = vrot.slane %v1119_v20, 4 }
 0x3ff   : > { %v1121_v14 = vadd.f32 %v1120_v19, %v1119_v20 }
 0x401   : > { %v1122_v41 = vrot.slane %v1121_v14, 2 }
 0x403   : > { %v1123_v51 = vadd.f32 %v1122_v41, %v1121_v14 }
 0x405   : > { %v1124_v4 = vrot.slane %v1123_v51, 1 }
 0x407   : > { %v1125_v10 = vadd.f32 %v1124_v4, %v1123_v51 }
 0x409   : > { %1511 = vpush %v1125_v10 }
 0x40c   : > { %v1193_v35 = vpop.f32.mrf.mxu1 }
 0x40d   : > { %1204 = vst [vmem:[%s345_s30] sm:$0xff] %v1193_v35 }
 0x40e   : > { %v1195_v33 = vpop.f32.mrf.mxu1 }
 0x40f   : > { %1205 = vst [vmem:[%s345_s30 + $0x8] sm:$0xff] %v1195_v33 }
 0x410   : > { %v1199_v62 = vpop.f32.mrf.mxu1 }
 0x411   : > { %1206 = vst [vmem:[%s345_s30 + $0x10] sm:$0xff] %v1199_v62 }
 0x412   : > { %v1201_v57 = vpop.f32.mrf.mxu1 }
 0x413   : > { %1207 = vst [vmem:[%s345_s30 + $0x18] sm:$0xff] %v1201_v57 }
 0x414   : > { %1851 = shalt.err (!%p1848_p2)
}
 0x415   : > { %s1852_s18 = scalar_lea.hbm %s2773_s8, 512  ;;  %s1856_s27 = scalar_lea.hbm %s2851_s3, 1024 }
 0x416   : > { %p1853_p5 = scmp.ne.s32.totalorder %s2773_s8, %s1852_s18  ;;  %p1857_p8 = scmp.lt.s32.totalorder %s2773_s8, %s2851_s3 }
 0x417   : > { %p1858_p0 = scmp.lt.s32.totalorder %s1856_s27, %s1852_s18 }
 0x418   : > { %p1854_p6 = pnand %p1853_p5, %p2050_p9 }
 0x419   : > { %p1859_p3 = por %p1858_p0, %p1857_p8 }
 0x41a   : > { %p1855_p7 = pneg %p1854_p6 }
 0x41c   : > { %p1860_p4 = pnand %p1859_p3, %p1855_p7 }
 0x41e   : > { %1863 = shalt.err (!%p1860_p4)
}
 0x41f   : > { %s1962_s29 = smov 256   ;;  %s1963_s30 = smov 16  }
 0x420   : > { %1519 = dma.vmem_to_hbm [thread:$0]  (%p2050_p9), %s2768_s13, 512, %s2773_s8, %s1212_s12, %s1962_s29, %s1962_s29, %s1963_s30  }
 0x421   : > { %s357_s25 = scalar_lea.vmem [#allocation11], %s2145_s10  ;;  %s1264_s16 = scalar_lea.hbm %s2853_s5, %s1501_s9 }
 0x422   : > { %s1266_s22 = sshll.u32 %s357_s25, 4  ;;  %s1964_s10 = smov [#allocation11]   ;;  %s2799_s22 = int_to_ptr.vmem [resolvable:$true] %s1266_s22 }
 0x423   : > { %s1864_s1 = scalar_lea.vmem %s2799_s22, 16  ;;  %s1868_s13 = sshll.u32 %s1964_s10, 4  ;;  %s1869_s13 = int_to_ptr.vmem [resolvable:$false] %s1868_s13 }
 0x424   : > { %p1865_p10 = scmp.ne.s32.totalorder %s2799_s22, %s1864_s1  ;;  %s1870_s8 = scalar_lea.vmem %s1869_s13, 32 }
 0x425   : > { %p1871_p1 = scmp.lt.s32.totalorder %s2799_s22, %s1869_s13  ;;  %p1872_p2 = scmp.lt.s32.totalorder %s1870_s8, %s1864_s1 }
 0x426   : > { %p1866_p13 = pnand %p1865_p10, %p2050_p9 }
 0x427   : > { %p1873_p5 = por %p1872_p2, %p1871_p1 }
 0x428   : > { %p1867_p12 = pneg %p1866_p13 }
 0x42a   : > { %p1874_p6 = pnand %p1873_p5, %p1867_p12 }
 0x43a   : > { %s1512_s26 = spop %1511 }
 0x43b   : > { %v1209_v5 = vstv %s1512_s26 }
 0x43c   : > { %1210 = vst [vmem:[%s357_s25] sm:$0x1] %v1209_v5 }
 0x43d   : > { %1877 = shalt.err (!%p1874_p6)
}
 0x43e   : > { %s1878_s21 = scalar_lea.hbm %s1264_s16, 16  ;;  %s1882_s18 = scalar_lea.hbm %s2853_s5, 32 }
 0x43f   : > { %p1879_p7 = scmp.ne.s32.totalorder %s1264_s16, %s1878_s21  ;;  %p1883_p3 = scmp.lt.s32.totalorder %s1264_s16, %s2853_s5 }
 0x440   : > { %p1884_p4 = scmp.lt.s32.totalorder %s1882_s18, %s1878_s21 }
 0x441   : > { %p1880_p8 = pnand %p1879_p7, %p2050_p9 }
 0x442   : > { %p1885_p10 = por %p1884_p4, %p1883_p3 }
 0x443   : > { %p1881_p0 = pneg %p1880_p8 }
 0x445   : > { %p1886_p13 = pnand %p1885_p10, %p1881_p0 }
 0x447   : > { %1889 = shalt.err (!%p1886_p13)
}
 0x448   : > { %1521 = dma.vmem_to_hbm [thread:$0]  (%p2050_p9), %s2799_s22, 16, %s1264_s16, %s2751_s15  }
 0x449 PF: > { %s2931_s27 = sld [smem:[#allocation16_spill]]  ;;  %p2933_p12 = scmp.ge.s32.totalorder %s1952_s23, 2 }
 0x44b   : > { %p1536_p1 = pnand %p2933_p12, %p2059_p11 }
 0x44d   : > { %p1537_p2 = pneg %p1536_p1 }
 0x44f   : > { %s1278_s11 = sand.u32 1, %s2931_s27  }
 0x450   : > { %s1279_s29 = scalar_lea.sflag [#allocation4], %s1278_s11 }
 0x451   : > { %1923 = dma.done.wait (%p1537_p2), %s1279_s29, 512  }
 0x452   : > { %1925 = vsyncadd (%p1537_p2), %s1279_s29, 4294966784  ;;  %s2934_s30 = sadd.s32 4294967294, %s1952_s23  }
 0x453   : > { %s1287_s25 = sand.u32 1, %s2934_s30  }
 0x454   : > { %s1288_s26 = scalar_lea.sflag [#allocation10], %s1287_s25 }
 0x455   : > { %1927 = dma.done.wait (%p1537_p2), %s1288_s26, 32  }
 0x456   : > { %1929 = vsyncadd (%p1537_p2), %s1288_s26, 4294967264  ;;  %s28_s23 = sadd.s32 1, %s1952_s23   ;;  %s2935_s6 = sld [smem:[#allocation19_spill]] }
 0x457   : > { %p25_p9 = scmp.ge.s32.totalorder %s28_s23, 4   ;;  %s2936_s21 = sld [smem:[#allocation17_spill]] }
 0x458   : > { %s2937_s22 = sld [smem:[#allocation18_spill]]  ;;  %s2938_s18 = smov %s1936_s19 }
 0x459   : > { %s2939_s19 = smov %s1940_s20  ;;  %27 = sbr.rel (!%p25_p9) target bundleno = 12 (0xc), region = 133 }
 0x45c   : > { %s2940_s20 = smov %s2935_s6 }
 0x45e   :  { %1300 = vsyncpa [#allocation3], 1 }
 0x45f   :  { %1302 = vsyncpa [#allocation3 + $0x1], 1 }
 0x460   :  { %1303 = vsyncpa [#allocation6], 1 }
 0x461   :  { %1305 = vsyncpa [#allocation6 + $0x1], 1 }
 0x462   :  { %1306 = vsyncpa [#allocation4], 1 }
 0x463   :  { %1308 = vsyncpa [#allocation4 + $0x1], 1 }
 0x464   :  { %1309 = vsyncpa [#allocation10], 1 }
 0x465   :  { %1311 = vsyncpa [#allocation10 + $0x1], 1 }

</bundles_post_ra>
